<compile_context>
chip_gen: v5e
topology: v5e:2x2
jax: 0.10.0
libtpu: 0.0.40
codegen_flags: <defaults>
</compile_context>

<pallas_src>
import functools
import math

import jax
import jax.numpy as jnp
from jax.experimental import pallas as pl
from jax.experimental.pallas import tpu as pltpu

_NEG_BIG = -1e30  # finite "masked" sentinel: no inf arithmetic, no NaN rows


def _proj_kernel(w_ref, x_ref, g_ref, e_ref, *, n_heads, n_hidden):
    # acc = W_ext @ x^T : (H*F + 2H, d_in) @ (d_in, bn) -> (H*F + 2H, bn), f32 acc
    acc = jnp.dot(w_ref[...], x_ref[...], preferred_element_type=jnp.float32)
    bn = x_ref.shape[1]
    # g written head-major & lane-dense: (H, F+1, bn); row F is ones so the
    # attention PV matmul also produces the softmax denominator.
    for h in range(n_heads):
        g_ref[h, :n_hidden, :] = acc[h * n_hidden:(h + 1) * n_hidden, :].astype(g_ref.dtype)
    g_ref[:, n_hidden:, :] = jnp.ones((n_heads, 1, bn), g_ref.dtype)
    # rows [H*F : H*F+H] = el per head, rows [H*F+H :] = er per head (f32)
    e_ref[...] = acc[n_heads * n_hidden:, :]


def _gat_attn_kernel(nnz_ref, gk_ref, el_ref, er_ref, adj_ref, out_ref,
                     m_scr, acc_scr, *, n_heads, n_hidden, neg_slope):
    i = pl.program_id(0)
    j = pl.program_id(1)
    nj = pl.num_programs(1)
    F = n_hidden

    @pl.when(j == 0)
    def _init():
        m_scr[...] = jnp.full(m_scr.shape, _NEG_BIG, m_scr.dtype)
        acc_scr[...] = jnp.zeros(acc_scr.shape, acc_scr.dtype)

    # Skip all compute for blocks with zero edges (scalar-prefetched counts).
    @pl.when(nnz_ref[i * nj + j] > 0)
    def _compute():
        # additive mask bias, computed once per block and shared across heads
        bias = jnp.where(adj_ref[...] != 0, 0.0, _NEG_BIG)       # (tj, ti) f32
        el_blk = el_ref[...]                                     # (H, ti)  f32
        er_blk = er_ref[...]                                     # (tj, H)  f32

        for h in range(n_heads):                                 # H is small & static
            # e^T[j, i] = leaky_relu(el[i] + er[j]) + bias[j, i]
            e = er_blk[:, h:h + 1] + el_blk[h:h + 1, :]          # (tj, ti)
            e = jnp.maximum(e, neg_slope * e) + bias             # slope in (0,1)

            m_prev = m_scr[h:h + 1, :]                           # (1, ti)
            m_new = jnp.maximum(m_prev, jnp.max(e, axis=0, keepdims=True))
            alpha = jnp.exp(m_prev - m_new)                      # (1, ti)
            p = jnp.exp(e - m_new).astype(gk_ref.dtype)          # (tj, ti) bf16

            # (F+1, tj) @ (tj, ti) -> (F+1, ti); last row of gk is ones, so
            # row F of pv is sum_j p (softmax denominator on the MXU).
            pv = jnp.dot(gk_ref[h], p, preferred_element_type=jnp.float32)
            acc_scr[h] = alpha * acc_scr[h] + pv                 # lane-dense rescale
            m_scr[h:h + 1, :] = m_new

    @pl.when(j == nj - 1)
    def _finalize():
        acc = acc_scr[...]                                       # (H, F+1, ti)
        l = acc[:, F:F + 1, :]                                   # (H, 1, ti)
        # exact divide (epilogue, once per i-block); rows with no edges -> 0
        out_ref[...] = (acc[:, :F, :] / jnp.where(l > 0.0, l, 1.0)).astype(out_ref.dtype)


def graph_attention_layer(h, adj_mat, w_lin, w_attn, *, n_heads,
                          is_concat=True, neg_slope=0.2,
                          block_i=128, block_j=None):
    """Pallas implementation of GraphAttentionLayer.forward (eval mode)."""
    B, d_in, n_nodes = h.shape
    assert B == 1  # TODO(synk): PyTorch forward only well-defined for effective batch 1
    hf = w_lin.shape[0]
    n_hidden = hf // n_heads
    assert adj_mat.shape[2] == 1  # TODO(synk): per-head adjacency masks unsupported

    if block_j is None:
        # 256-deep contraction feeds the 256-wide MXU on v6e/v7x; 128 for v5e / small graphs.
        block_j = 256 if n_nodes >= 1024 else 128

    lcm = block_i * block_j // math.gcd(block_i, block_j)
    n_pad = ((n_nodes + lcm - 1) // lcm) * lcm
    pad_n = n_pad - n_nodes

    # ---- layout plumbing (plain JAX): padding, dtype, parameter folding ----
    x_t = jnp.pad(h[0], ((0, 0), (0, pad_n))).astype(jnp.bfloat16)      # (d_in, N_pad)

    a_l = w_attn[0, :n_hidden]
    a_r = w_attn[0, n_hidden:]
    w_h = w_lin.reshape(n_heads, n_hidden, d_in)
    w_ext = jnp.concatenate(                                            # (H*F + 2H, d_in)
        [w_lin,
         jnp.einsum('f,hfd->hd', a_l, w_h),    # el rows: (a_l . W_h)
         jnp.einsum('f,hfd->hd', a_r, w_h)],   # er rows: (a_r . W_h)
        axis=0).astype(jnp.bfloat16)

    adj2d = jnp.broadcast_to(adj_mat[:, :, 0] != 0, (n_nodes, n_nodes))
    adj_p = jnp.pad(adj2d, ((0, pad_n), (0, pad_n)))                    # bool (N_pad, N_pad)
    ni, nj = n_pad // block_i, n_pad // block_j
    blk_nnz = adj_p.astype(jnp.int32).reshape(
        ni, block_i, nj, block_j).sum(axis=(1, 3)).reshape(-1)          # (ni*nj,) int32
    adj_t = jnp.transpose(adj_p).astype(jnp.int8)                       # [j, i] orientation
    # TODO(synk): bit-pack adjacency (8 edges/byte) for very large N.

    # ---- kernel 1: fused projection  (g, el, er) = W_ext @ x^T ----
    proj_bn = n_pad if n_pad <= 2048 else next(
        c for c in (2048, 1024, 512, 256, 128) if n_pad % c == 0)
    g_ext, eler = pl.pallas_call(
        functools.partial(_proj_kernel, n_heads=n_heads, n_hidden=n_hidden),
        out_shape=(jax.ShapeDtypeStruct((n_heads, n_hidden + 1, n_pad), jnp.bfloat16),
                   jax.ShapeDtypeStruct((2 * n_heads, n_pad), jnp.float32)),
        grid_spec=pltpu.PrefetchScalarGridSpec(
            num_scalar_prefetch=0,
            grid=(n_pad // proj_bn,),
            in_specs=[pl.BlockSpec((hf + 2 * n_heads, d_in), lambda i: (0, 0)),
                      pl.BlockSpec((d_in, proj_bn), lambda i: (0, i))],
            out_specs=[pl.BlockSpec((n_heads, n_hidden + 1, proj_bn), lambda i: (0, 0, i)),
                       pl.BlockSpec((2 * n_heads, proj_bn), lambda i: (0, i))]),
        compiler_params=pltpu.CompilerParams(dimension_semantics=("parallel",)),
    )(w_ext, x_t)

    el = eler[:n_heads]                       # (H, N_pad) f32, node dim on lanes
    er_nm = jnp.transpose(eler[n_heads:])     # (N_pad, H) f32, node dim on sublanes

    # ---- kernel 2: gridded online-softmax attention ----
    kernel = functools.partial(_gat_attn_kernel, n_heads=n_heads,
                               n_hidden=n_hidden, neg_slope=neg_slope)

    cost = pl.CostEstimate(
        flops=2 * n_heads * n_pad * n_pad * (n_hidden + 1) + 10 * n_heads * n_pad * n_pad,
        transcendentals=n_heads * n_pad * n_pad,
        bytes_accessed=(ni * (n_heads * (n_hidden + 1) * n_pad * 2      # g re-read per i-block
                              + n_pad * n_heads * 4)                    # er re-read per i-block
                        + n_pad * n_pad                                 # adjacency (int8), once
                        + n_heads * n_pad * 4                           # el
                        + n_heads * n_hidden * n_pad * 4))              # output (f32)

    out_hm = pl.pallas_call(
        kernel,
        out_shape=jax.ShapeDtypeStruct((n_heads, n_hidden, n_pad), jnp.float32),
        grid_spec=pltpu.PrefetchScalarGridSpec(
            num_scalar_prefetch=1,
            grid=(ni, nj),
            in_specs=[
                pl.BlockSpec((n_heads, n_hidden + 1, block_j), lambda i, j, nnz: (0, 0, j)),
                pl.BlockSpec((n_heads, block_i), lambda i, j, nnz: (0, i)),
                pl.BlockSpec((block_j, n_heads), lambda i, j, nnz: (j, 0)),
                pl.BlockSpec((block_j, block_i), lambda i, j, nnz: (j, i)),
            ],
            out_specs=pl.BlockSpec((n_heads, n_hidden, block_i),
                                   lambda i, j, nnz: (0, 0, i)),
            scratch_shapes=[
                pltpu.VMEM((n_heads, block_i), jnp.float32),                 # running max
                pltpu.VMEM((n_heads, n_hidden + 1, block_i), jnp.float32),   # acc (+l row)
            ]),
        compiler_params=pltpu.CompilerParams(
            dimension_semantics=("parallel", "arbitrary")),
        cost_estimate=cost,
    )(blk_nnz, g_ext, el, er_nm, adj_t)

    out_nm = jnp.transpose(out_hm, (2, 0, 1))[:n_nodes]       # (N, H, F)
    if is_concat:
        return out_nm.reshape(n_nodes, hf)
    return jnp.mean(out_nm, axis=1)


def gat_reference(h, adj_mat, w_lin, w_attn, *, n_heads, is_concat=True, neg_slope=0.2):
    """Pure-JAX reference mirroring the PyTorch forward (dropout = identity)."""
    _, _, n = h.shape
    x = jnp.transpose(h[0])
    hf = w_lin.shape[0]
    f = hf // n_heads
    g = (x @ w_lin.T).reshape(n, n_heads, f)
    gi = jnp.broadcast_to(g[:, None], (n, n, n_heads, f))
    gj = jnp.broadcast_to(g[None, :], (n, n, n_heads, f))
    gcat = jnp.concatenate([gi, gj], axis=-1)              # (N, N, H, 2F)
    e = jnp.einsum('ijhk,k->ijh', gcat, w_attn[0])
    e = jnp.where(e >= 0, e, neg_slope * e)
    mask = jnp.broadcast_to(adj_mat, (n, n, n_heads)) == 0
    e = jnp.where(mask, -jnp.inf, e)
    a = jax.nn.softmax(e, axis=1)
    out = jnp.einsum('ijh,jhf->ihf', a, g)
    if is_concat:
        return out.reshape(n, hf)
    return out.mean(axis=1)


if __name__ == "__main__":
    in_features = 16
    out_features = 32
    n_heads = 4
    n_hidden = out_features // n_heads   # is_concat=True
    n_nodes = 8

    key = jax.random.PRNGKey(0)
    k1, k2, k3, k4 = jax.random.split(key, 4)

    # inputs: h is (B=1, in_features, n_nodes); adj_mat is (N, N, 1)
    h = jax.random.normal(k1, (1, in_features, n_nodes), jnp.float32)
    adj = (jax.random.uniform(k2, (n_nodes, n_nodes, 1)) > 0.4).astype(jnp.float32)
    adj = jnp.maximum(adj, jnp.eye(n_nodes, dtype=jnp.float32)[:, :, None])  # self loops

    # deterministic parameter init (nn.Linear weights, no bias)
    w_lin = 0.1 * jax.random.normal(k3, (n_heads * n_hidden, in_features), jnp.float32)
    w_attn = 0.1 * jax.random.normal(k4, (1, 2 * n_hidden), jnp.float32)

    out = graph_attention_layer(h, adj, w_lin, w_attn, n_heads=n_heads,
                                is_concat=True, neg_slope=0.2)
    out = jax.block_until_ready(out)

    ref = gat_reference(h, adj, w_lin, w_attn, n_heads=n_heads,
                        is_concat=True, neg_slope=0.2)
    assert out.shape == (n_nodes, n_heads * n_hidden)
    # bf16 MXU inputs -> ~1e-2 relative tolerance
    assert jnp.allclose(out, ref, rtol=2e-2, atol=2e-2), "mismatch vs reference"
    assert not jnp.any(jnp.isnan(out)), "NaN in kernel output"

    print("KERNEL_OK")
</pallas_src>

<mosaic_0001>
module attributes {stable_mosaic.version = 11 : i64} {
  func.func @_proj_kernel(%arg0: i32, %arg1: memref<40x16xbf16, #tpu.memory_space<vmem>>, %arg2: memref<16x128xbf16, #tpu.memory_space<vmem>>, %arg3: memref<4x9x128xbf16, #tpu.memory_space<vmem>>, %arg4: memref<8x128xf32, #tpu.memory_space<vmem>>) attributes {dimension_semantics = [#tpu.dimension_semantics<parallel>], iteration_bounds = array<i64: 1>, scalar_prefetch = 0 : i64, scratch_operands = 0 : i64, tpu.core_type = #tpu.core_type<tc>, window_params = [{pipeline_mode = #tpu.pipeline_mode<synchronous>, transform_indices = @transform_0, window_bounds = array<i64: 40, 16>}, {transform_indices = @transform_1, window_bounds = array<i64: 16, 128>}, {transform_indices = @transform_2, window_bounds = array<i64: 4, 9, 128>}, {transform_indices = @transform_3, window_bounds = array<i64: 8, 128>}]} {
    %c0 = arith.constant 0 : index
    %c0_0 = arith.constant 0 : index
    %0 = vector.load %arg1[%c0, %c0_0] : memref<40x16xbf16, #tpu.memory_space<vmem>>, vector<40x16xbf16>
    %c0_1 = arith.constant 0 : index
    %c0_2 = arith.constant 0 : index
    %1 = vector.load %arg2[%c0_1, %c0_2] : memref<16x128xbf16, #tpu.memory_space<vmem>>, vector<16x128xbf16>
    %cst = arith.constant dense<0.000000e+00> : vector<40x128xf32>
    %2 = tpu.matmul %0, %1, %cst {dimension_numbers = #tpu.dot_dimension_numbers<[1], [0], [0], [1], [0, 0, 1, 1], [], []>} : vector<40x16xbf16>, vector<16x128xbf16>, vector<40x128xf32> -> vector<40x128xf32>
    %3 = vector.extract_strided_slice %2 {offsets = [0, 0], sizes = [8, 128], strides = [1, 1]} : vector<40x128xf32> to vector<8x128xf32>
    %4 = arith.truncf %3 : vector<8x128xf32> to vector<8x128xbf16>
    %c0_3 = arith.constant 0 : index
    %c0_4 = arith.constant 0 : index
    %c0_5 = arith.constant 0 : index
    %5 = vector.load %arg3[%c0_3, %c0_4, %c0_5] : memref<4x9x128xbf16, #tpu.memory_space<vmem>>, vector<1x8x128xbf16>
    %6 = vector.shape_cast %5 : vector<1x8x128xbf16> to vector<8x128xbf16>
    %7 = vector.shape_cast %4 : vector<8x128xbf16> to vector<1x8x128xbf16>
    tpu.vector_store %arg3[%c0_3, %c0_4, %c0_5], %7 {strides = array<i32>} : memref<4x9x128xbf16, #tpu.memory_space<vmem>>, vector<1x8x128xbf16>,
    %8 = vector.extract_strided_slice %2 {offsets = [8, 0], sizes = [8, 128], strides = [1, 1]} : vector<40x128xf32> to vector<8x128xf32>
    %9 = arith.truncf %8 : vector<8x128xf32> to vector<8x128xbf16>
    %c1 = arith.constant 1 : index
    %c0_6 = arith.constant 0 : index
    %c0_7 = arith.constant 0 : index
    %10 = vector.load %arg3[%c1, %c0_6, %c0_7] : memref<4x9x128xbf16, #tpu.memory_space<vmem>>, vector<1x8x128xbf16>
    %11 = vector.shape_cast %10 : vector<1x8x128xbf16> to vector<8x128xbf16>
    %12 = vector.shape_cast %9 : vector<8x128xbf16> to vector<1x8x128xbf16>
    tpu.vector_store %arg3[%c1, %c0_6, %c0_7], %12 {strides = array<i32>} : memref<4x9x128xbf16, #tpu.memory_space<vmem>>, vector<1x8x128xbf16>,
    %13 = vector.extract_strided_slice %2 {offsets = [16, 0], sizes = [8, 128], strides = [1, 1]} : vector<40x128xf32> to vector<8x128xf32>
    %14 = arith.truncf %13 : vector<8x128xf32> to vector<8x128xbf16>
    %c2 = arith.constant 2 : index
    %c0_8 = arith.constant 0 : index
    %c0_9 = arith.constant 0 : index
    %15 = vector.load %arg3[%c2, %c0_8, %c0_9] : memref<4x9x128xbf16, #tpu.memory_space<vmem>>, vector<1x8x128xbf16>
    %16 = vector.shape_cast %15 : vector<1x8x128xbf16> to vector<8x128xbf16>
    %17 = vector.shape_cast %14 : vector<8x128xbf16> to vector<1x8x128xbf16>
    tpu.vector_store %arg3[%c2, %c0_8, %c0_9], %17 {strides = array<i32>} : memref<4x9x128xbf16, #tpu.memory_space<vmem>>, vector<1x8x128xbf16>,
    %18 = vector.extract_strided_slice %2 {offsets = [24, 0], sizes = [8, 128], strides = [1, 1]} : vector<40x128xf32> to vector<8x128xf32>
    %19 = arith.truncf %18 : vector<8x128xf32> to vector<8x128xbf16>
    %c3 = arith.constant 3 : index
    %c0_10 = arith.constant 0 : index
    %c0_11 = arith.constant 0 : index
    %20 = vector.load %arg3[%c3, %c0_10, %c0_11] : memref<4x9x128xbf16, #tpu.memory_space<vmem>>, vector<1x8x128xbf16>
    %21 = vector.shape_cast %20 : vector<1x8x128xbf16> to vector<8x128xbf16>
    %22 = vector.shape_cast %19 : vector<8x128xbf16> to vector<1x8x128xbf16>
    tpu.vector_store %arg3[%c3, %c0_10, %c0_11], %22 {strides = array<i32>} : memref<4x9x128xbf16, #tpu.memory_space<vmem>>, vector<1x8x128xbf16>,
    %cst_12 = arith.constant 1.000000e+00 : bf16
    %23 = vector.broadcast %cst_12 : bf16 to vector<4x1x128xbf16>
    %c0_13 = arith.constant 0 : index
    %c8 = arith.constant 8 : index
    %c0_14 = arith.constant 0 : index
    %24 = vector.load %arg3[%c0_13, %c8, %c0_14] : memref<4x9x128xbf16, #tpu.memory_space<vmem>>, vector<4x1x128xbf16>
    tpu.vector_store %arg3[%c0_13, %c8, %c0_14], %23 {strides = array<i32>} : memref<4x9x128xbf16, #tpu.memory_space<vmem>>, vector<4x1x128xbf16>,
    %25 = vector.extract_strided_slice %2 {offsets = [32, 0], sizes = [8, 128], strides = [1, 1]} : vector<40x128xf32> to vector<8x128xf32>
    %c0_15 = arith.constant 0 : index
    %c0_16 = arith.constant 0 : index
    %26 = vector.load %arg4[%c0_15, %c0_16] : memref<8x128xf32, #tpu.memory_space<vmem>>, vector<8x128xf32>
    tpu.vector_store %arg4[%c0_15, %c0_16], %25 {strides = array<i32>} : memref<8x128xf32, #tpu.memory_space<vmem>>, vector<8x128xf32>,
    return
  }
  func.func @transform_0(%arg0: i32) -> (i32, i32) {
    %c0_i32 = arith.constant 0 : i32
    %c0_i32_0 = arith.constant 0 : i32
    %c0_i32_1 = arith.constant 0 : i32
    return %c0_i32, %c0_i32_0 : i32, i32
  }
  func.func @transform_1(%arg0: i32) -> (i32, i32) {
    %c0_i32 = arith.constant 0 : i32
    %c0_i32_0 = arith.constant 0 : i32
    return %c0_i32, %arg0 : i32, i32
  }
  func.func @transform_2(%arg0: i32) -> (i32, i32, i32) {
    %c0_i32 = arith.constant 0 : i32
    %c0_i32_0 = arith.constant 0 : i32
    %c0_i32_1 = arith.constant 0 : i32
    return %c0_i32, %c0_i32_0, %arg0 : i32, i32, i32
  }
  func.func @transform_3(%arg0: i32) -> (i32, i32) {
    %c0_i32 = arith.constant 0 : i32
    %c0_i32_0 = arith.constant 0 : i32
    return %c0_i32, %arg0 : i32, i32
  }
}

</mosaic_0001>

<bundles_post_ra>
// kernel: tpu_custom_call.1
= control target key start
LH: loop header
LB: loop body
LE: loop exit
PB: predicated region body
PF: predicated region fallthrough
CT: control target
= control target key end

     0   :  { %s244_s0 = inlined_call_operand.vmem [shape: bf16[40,16], index: 0, kind: input, shape index: {}]   ;;  %s245_s1 = inlined_call_operand.vmem [shape: bf16[16,128], index: 1, kind: input, shape index: {}]   ;;  %s246_s2 = inlined_call_operand.vmem [shape: bf16[4,9,128], index: 2, kind: output, shape index: {0}]   ;;  %s247_s3 = inlined_call_operand.hbm [shape: f32[8,128], index: 3, kind: output, shape index: {1}]  }
   0x1   :  { %v142_v0 = vld [vmem:[%s245_s1] sm:$0xff]  ;;  %v141_v2 = vld [vmem:[%s244_s0 + $0x8] sm:$0xff]  ;;  %v20_v3 = vld [vmem:[%s244_s0 + $0x10] sm:$0xf] }
   0x2   :  { %v140_v1 = vld [vmem:[%s244_s0] sm:$0xff] }
   0x3   :  { %9 = vsyncpa [#allocation3], 0  ;;  %59 = vmatpush.bf16.msra.mxu0 %v142_v0  ;;  %143 = vmatpush.bf16.msra.mxu1 %v142_v0  ;;  %vm42_vm0 = vcmask 130048   ;;  %v32_v4 = vunpack.c.l.b16 %v20_v3  ;;  %vm86_vm1 = vcmask 1040384   ;;  %vm87_vm2 = vsmask.f32 256 }
   0x4   :  { %144 = vmatpush.bf16.msra.mxu2 %v142_v0  ;;  %vm88_vm3 = vmand %vm86_vm1, %vm87_vm2  ;;  %v89_v6 = vld [vmem:[%s246_s2 + $0x4] sm:$0x1]  ;;  %v92_v7 = vld [vmem:[%s246_s2 + $0xc] sm:$0x1]  ;;  %s172_s9 = smov [#allocation2]   ;;  %s111_s13 = sshll.u32 %s247_s3, 4  ;;  %s112_s13 = int_to_ptr.hbm [resolvable:$true] %s111_s13 }
   0x5   :  { %v35_v5 = vpack.c.b16 %v32_v4, %v32_v4  ;;  %v90_v8 = vsel %vm88_vm3, 1065369472, %v89_v6  ;;  %v93_v9 = vsel %vm88_vm3, 1065369472, %v92_v7  ;;  %v95_v10 = vld [vmem:[%s246_s2 + $0x14] sm:$0x1] }
   0x6   :  { %134 = vmatmul.msk.bf16.vlgmr.msra.gmra.mxu0 %vm42_vm0, %v140_v1  ;;  %135 = vmatmul.msk.bf16.vlgmr.msra.gmra.mxu1 %vm42_vm0, %v141_v2  ;;  %91 = vst [vmem:[%s246_s2 + $0x4] sm:$0x1] %v90_v8  ;;  %v96_v11 = vsel %vm88_vm3, 1065369472, %v95_v10  ;;  %v98_v12 = vld [vmem:[%s246_s2 + $0x1c] sm:$0x1] }
   0x7   :  { %136 = vmatmul.msk.bf16.vlgmr.msra.gmra.mxu2 %vm42_vm0, %v35_v5  ;;  %94 = vst [vmem:[%s246_s2 + $0xc] sm:$0x1] %v93_v9  ;;  %v99_v13 = vsel %vm88_vm3, 1065369472, %v98_v12  ;;  %s109_s10 = sshll.u32 %s172_s9, 4  ;;  %s110_s10 = int_to_ptr.vmem [resolvable:$true] %s109_s10 }
   0x8   :  { %97 = vst [vmem:[%s246_s2 + $0x14] sm:$0x1] %v96_v11 }
   0x9   :  { %100 = vst [vmem:[%s246_s2 + $0x1c] sm:$0x1] %v99_v13 }
  0x83   :  { %v61_v14 = vpop.f32.mrf.mxu0  ;;  %v66_v15 = vpop.f32.mrf.mxu1 }
  0x84   :  { %v75_v16 = vpack.c.bf16 %v61_v14, %v61_v14  ;;  %v80_v17 = vpack.c.bf16 %v66_v15, %v66_v15 }
  0x86   :  { %76 = vst [vmem:[%s246_s2] sm:$0xf] %v75_v16 }
  0x87   :  { %138 = vst [vmem:[%s246_s2 + $0x10] sm:$0xf] %v80_v17 }
  0x8a   :  { %v71_v18 = vpop.f32.mrf.mxu2 }
  0x8b   :  { %101 = vst [vmem:[#allocation2] sm:$0xff] %v71_v18  ;;  %v63_v19 = vpop.f32.mrf.mxu0  ;;  %v68_v20 = vpop.f32.mrf.mxu1 }
  0x8c   :  { %v77_v21 = vpack.c.bf16 %v63_v19, %v63_v19  ;;  %v83_v22 = vpack.c.bf16 %v68_v20, %v68_v20  ;;  %114 = dma.vmem_to_hbm [thread:$0]  %s110_s10, 128, %s112_s13, [#allocation3]  }
  0x8e   :  { %137 = vst [vmem:[%s246_s2 + $0x8] sm:$0xf] %v77_v21 }
  0x8f   :  { %139 = vst [vmem:[%s246_s2 + $0x18] sm:$0xf] %v83_v22 }
  0x92   :  { %v73_v23 = vpop.f32.mrf.mxu2 }
  0x93   :  { %170 = dma.done.wait [#allocation3], 128  }
  0x94   :  { %171 = vsyncadd [#allocation3], 4294967168 }
  0x95   :  { %121 = vsyncpa [#allocation3], 1 }

</bundles_post_ra>
